<compile_context>
chip_gen: v7x
topology: tpu7x:2x2x1
jax: 0.10.0
libtpu: 0.0.40
codegen_flags: <defaults>
</compile_context>

<pallas_src>
import jax
import jax.numpy as jnp
import numpy as np
from jax.experimental import pallas as pl
from jax.experimental.pallas import tpu as pltpu

EXC_FSIZE = 7
PAD = (EXC_FSIZE - 1) // 2
EPS = 1e-5


def _group_norm(v, gamma, beta):
    """GroupNorm(num_groups=1) for one sample laid out as (C, H*W).

    Single-pass statistics: one reduce for sum, one for sum-of-squares.
    gamma/beta are (C, 1) column vectors (broadcast along the lane axis).
    """
    inv_n = 1.0 / float(v.size)
    s = jnp.sum(v)
    sq = jnp.sum(v * v)
    mu = s * inv_n
    var = sq * inv_n - mu * mu
    return (v - mu) * jax.lax.rsqrt(var + EPS) * gamma + beta


def ext_rnn_cell_kernel(
    x_ref,       # (1, Cin, HW)       input, transposed / flattened spatial
    e_ref,       # (1, Ch,  HW)       exc (unpadded), transposed
    p_ref,       # (1, 49*Ch, HW)     im2col patches of padded exc
    wgx_ref,     # (Ch, Cin)          g_exc_x  (1x1 conv as matmul)
    bgx_ref,     # (Ch, 1)
    g1g_ref,     # (Ch, 1)            ln_e_x gamma
    g1b_ref,     # (Ch, 1)            ln_e_x beta
    wge_ref,     # (Ch, Ch)           g_exc_e
    bge_ref,     # (Ch, 1)
    g2g_ref,     # (Ch, 1)            ln_e_e gamma
    g2b_ref,     # (Ch, 1)            ln_e_e beta
    wwx_ref,     # (Ch, Cin)          w_exc_x
    bwx_ref,     # (Ch, 1)
    wee_ref,     # (Ch, 49*Ch)        w_exc_ee as a single im2col matrix
    bee_ref,     # (Ch, 1)
    g3g_ref,     # (Ch, 1)            ln_out_e gamma
    g3b_ref,     # (Ch, 1)            ln_out_e beta
    out_ref,     # (1, Ch, HW)
):
    x = x_ref[0]        # (Cin, HW)
    e = e_ref[0]        # (Ch,  HW)
    patch = p_ref[0]    # (49*Ch, HW)

    # gate path: sigmoid( LN(1x1(x)) + LN(1x1(exc)) )
    gx = jnp.dot(wgx_ref[...], x, preferred_element_type=jnp.float32) + bgx_ref[...]
    ge = jnp.dot(wge_ref[...], e, preferred_element_type=jnp.float32) + bge_ref[...]
    g = jax.nn.sigmoid(
        _group_norm(gx, g1g_ref[...], g1b_ref[...])
        + _group_norm(ge, g2g_ref[...], g2b_ref[...])
    )

    # candidate path: relu( 1x1(x) + conv7x7(exc) )  -- conv as one K=392 matmul
    wx = jnp.dot(wwx_ref[...], x, preferred_element_type=jnp.float32) + bwx_ref[...]
    conv = jnp.dot(wee_ref[...], patch, preferred_element_type=jnp.float32) + bee_ref[...]
    e_hat = jnp.maximum(wx + conv, 0.0)

    # blend + output norm + relu
    pre = g * e_hat + (1.0 - g) * e
    out = jnp.maximum(_group_norm(pre, g3g_ref[...], g3b_ref[...]), 0.0)
    out_ref[0] = out.astype(out_ref.dtype)


def ext_rnn_cell(x_nchw, exc_nchw, params):
    """x_nchw: (N, Cin, H, W), exc_nchw: (N, Ch, H, W) -> (N, Ch, H, W)."""
    N, Cin, H, W = x_nchw.shape
    Ch = exc_nchw.shape[1]
    HW = H * W
    K49 = EXC_FSIZE * EXC_FSIZE * Ch

    # ---- one-time layout plumbing in the wrapper (outside the grid) ----------
    x_t = x_nchw.reshape(N, Cin, HW)
    e_t = exc_nchw.reshape(N, Ch, HW)

    # im2col of the spatially padded exc: rows ordered (kh, kw, c_in).
    ep = jnp.pad(exc_nchw, ((0, 0), (0, 0), (PAD, PAD), (PAD, PAD)))
    taps = [
        ep[:, :, kh:kh + H, kw:kw + W].reshape(N, Ch, HW)
        for kh in range(EXC_FSIZE)
        for kw in range(EXC_FSIZE)
    ]
    patch_t = jnp.concatenate(taps, axis=1)              # (N, 49*Ch, HW)

    # 1x1 conv weights (PyTorch OIHW) -> (O, I) matmul matrices.
    wgx_t = params["g_exc_x_w"].reshape(Ch, Cin)
    wge_t = params["g_exc_e_w"].reshape(Ch, Ch)
    wwx_t = params["w_exc_x_w"].reshape(Ch, Cin)
    # 7x7 conv weight (O, I, kh, kw) -> (O, kh, kw, I) -> (O, 49*I),
    # matching the (kh, kw, c_in) ordering of the patch rows.
    wee_t = jnp.transpose(params["w_exc_ee_w"], (0, 2, 3, 1)).reshape(Ch, K49)

    col = lambda v: v.reshape(Ch, 1)                      # per-channel columns

    def fixed(shape):
        n = len(shape)
        return pl.BlockSpec(shape, lambda b, _n=n: (0,) * _n)

    in_specs = [
        pl.BlockSpec((1, Cin, HW), lambda b: (b, 0, 0)),   # x_t
        pl.BlockSpec((1, Ch, HW), lambda b: (b, 0, 0)),    # e_t
        pl.BlockSpec((1, K49, HW), lambda b: (b, 0, 0)),   # patch_t
        fixed((Ch, Cin)),  # wgx
        fixed((Ch, 1)),    # bgx
        fixed((Ch, 1)),    # g1 gamma
        fixed((Ch, 1)),    # g1 beta
        fixed((Ch, Ch)),   # wge
        fixed((Ch, 1)),    # bge
        fixed((Ch, 1)),    # g2 gamma
        fixed((Ch, 1)),    # g2 beta
        fixed((Ch, Cin)),  # wwx
        fixed((Ch, 1)),    # bwx
        fixed((Ch, K49)),  # wee (im2col matrix)
        fixed((Ch, 1)),    # bee
        fixed((Ch, 1)),    # g3 gamma
        fixed((Ch, 1)),    # g3 beta
    ]

    fn = pl.pallas_call(
        ext_rnn_cell_kernel,
        out_shape=jax.ShapeDtypeStruct((N, Ch, HW), jnp.float32),
        grid=(N,),
        in_specs=in_specs,
        out_specs=pl.BlockSpec((1, Ch, HW), lambda b: (b, 0, 0)),
        compiler_params=pltpu.CompilerParams(
            dimension_semantics=("parallel",)),
    )
    out = fn(
        x_t, e_t, patch_t,
        wgx_t, col(params["g_exc_x_b"]),
        col(params["ln_e_x_g"]), col(params["ln_e_x_b"]),
        wge_t, col(params["g_exc_e_b"]),
        col(params["ln_e_e_g"]), col(params["ln_e_e_b"]),
        wwx_t, col(params["w_exc_x_b"]),
        wee_t, col(params["w_exc_ee_b"]),
        col(params["ln_out_e_g"]), col(params["ln_out_e_b"]),
    )
    return out.reshape(N, Ch, H, W)


def ref_forward(x, exc, params):
    """Pure-JAX reference, NCHW, matching the PyTorch module."""
    def gn(v, gamma, beta):
        mu = jnp.mean(v, axis=(1, 2, 3), keepdims=True)
        var = jnp.mean((v - mu) ** 2, axis=(1, 2, 3), keepdims=True)
        return ((v - mu) * jax.lax.rsqrt(var + EPS)
                * gamma.reshape(1, -1, 1, 1) + beta.reshape(1, -1, 1, 1))

    def conv(v, w, b, pad):
        y = jax.lax.conv_general_dilated(
            v, w, window_strides=(1, 1), padding=[(pad, pad), (pad, pad)],
            dimension_numbers=("NCHW", "OIHW", "NCHW"))
        return y + b.reshape(1, -1, 1, 1)

    gx = conv(x, params["g_exc_x_w"], params["g_exc_x_b"], 0)
    ge = conv(exc, params["g_exc_e_w"], params["g_exc_e_b"], 0)
    g = jax.nn.sigmoid(gn(gx, params["ln_e_x_g"], params["ln_e_x_b"])
                       + gn(ge, params["ln_e_e_g"], params["ln_e_e_b"]))
    e_hat = jax.nn.relu(conv(x, params["w_exc_x_w"], params["w_exc_x_b"], 0)
                        + conv(exc, params["w_exc_ee_w"], params["w_exc_ee_b"], PAD))
    pre = g * e_hat + (1.0 - g) * exc
    return jax.nn.relu(gn(pre, params["ln_out_e_g"], params["ln_out_e_b"]))


def make_params(key, in_channels, hidden_dim):
    ks = jax.random.split(key, 12)
    n = lambda k, s, scale=0.1: (scale * jax.random.normal(k, s)).astype(jnp.float32)
    return {
        "g_exc_x_w": n(ks[0], (hidden_dim, in_channels, 1, 1)),
        "g_exc_x_b": n(ks[1], (hidden_dim,)),
        "ln_e_x_g": 1.0 + n(ks[2], (hidden_dim,)),
        "ln_e_x_b": n(ks[3], (hidden_dim,)),
        "g_exc_e_w": n(ks[4], (hidden_dim, hidden_dim, 1, 1)),
        "g_exc_e_b": n(ks[5], (hidden_dim,)),
        "ln_e_e_g": 1.0 + n(ks[6], (hidden_dim,)),
        "ln_e_e_b": n(ks[7], (hidden_dim,)),
        "w_exc_x_w": n(ks[8], (hidden_dim, in_channels, EXC_FSIZE, EXC_FSIZE)[:2] + (1, 1)),
        "w_exc_x_b": n(ks[9], (hidden_dim,)),
        "w_exc_ee_w": n(ks[10], (hidden_dim, hidden_dim, EXC_FSIZE, EXC_FSIZE), 0.05),
        "w_exc_ee_b": n(ks[11], (hidden_dim,)),
        "ln_out_e_g": jnp.ones((hidden_dim,), jnp.float32),
        "ln_out_e_b": jnp.zeros((hidden_dim,), jnp.float32),
    }


if __name__ == "__main__":
    N, Cin, Ch, H, W = 2, 4, 8, 16, 16

    key = jax.random.PRNGKey(0)
    kx, ke, kp = jax.random.split(key, 3)
    # PyTorch-convention NCHW inputs.
    x = jax.random.normal(kx, (N, Cin, H, W), dtype=jnp.float32)
    exc = jax.random.normal(ke, (N, Ch, H, W), dtype=jnp.float32)
    params = make_params(kp, Cin, Ch)

    out = jax.block_until_ready(ext_rnn_cell(x, exc, params))
    ref = jax.block_until_ready(ref_forward(x, exc, params))

    np.testing.assert_allclose(np.asarray(out), np.asarray(ref),
                               rtol=1e-4, atol=1e-4)
    print("KERNEL_OK")
</pallas_src>

<mosaic_0001>
module attributes {stable_mosaic.version = 11 : i64} {
  func.func @ext_rnn_cell_kernel(%arg0: i32, %arg1: memref<1x4x256xf32, #tpu.memory_space<vmem>>, %arg2: memref<1x8x256xf32, #tpu.memory_space<vmem>>, %arg3: memref<1x392x256xf32, #tpu.memory_space<vmem>>, %arg4: memref<8x4xf32, #tpu.memory_space<vmem>>, %arg5: memref<8x1xf32, #tpu.memory_space<vmem>>, %arg6: memref<8x1xf32, #tpu.memory_space<vmem>>, %arg7: memref<8x1xf32, #tpu.memory_space<vmem>>, %arg8: memref<8x8xf32, #tpu.memory_space<vmem>>, %arg9: memref<8x1xf32, #tpu.memory_space<vmem>>, %arg10: memref<8x1xf32, #tpu.memory_space<vmem>>, %arg11: memref<8x1xf32, #tpu.memory_space<vmem>>, %arg12: memref<8x4xf32, #tpu.memory_space<vmem>>, %arg13: memref<8x1xf32, #tpu.memory_space<vmem>>, %arg14: memref<8x392xf32, #tpu.memory_space<vmem>>, %arg15: memref<8x1xf32, #tpu.memory_space<vmem>>, %arg16: memref<8x1xf32, #tpu.memory_space<vmem>>, %arg17: memref<8x1xf32, #tpu.memory_space<vmem>>, %arg18: memref<1x8x256xf32, #tpu.memory_space<vmem>>) attributes {dimension_semantics = [#tpu.dimension_semantics<parallel>], iteration_bounds = array<i64: 2>, scalar_prefetch = 0 : i64, scratch_operands = 0 : i64, tpu.core_type = #tpu.core_type<tc>, window_params = [{transform_indices = @transform_0, window_bounds = array<i64: 1, 4, 256>}, {transform_indices = @transform_1, window_bounds = array<i64: 1, 8, 256>}, {transform_indices = @transform_2, window_bounds = array<i64: 1, 392, 256>}, {pipeline_mode = #tpu.pipeline_mode<synchronous>, transform_indices = @transform_3, window_bounds = array<i64: 8, 4>}, {pipeline_mode = #tpu.pipeline_mode<synchronous>, transform_indices = @transform_4, window_bounds = array<i64: 8, 1>}, {pipeline_mode = #tpu.pipeline_mode<synchronous>, transform_indices = @transform_5, window_bounds = array<i64: 8, 1>}, {pipeline_mode = #tpu.pipeline_mode<synchronous>, transform_indices = @transform_6, window_bounds = array<i64: 8, 1>}, {pipeline_mode = #tpu.pipeline_mode<synchronous>, transform_indices = @transform_7, window_bounds = array<i64: 8, 8>}, {pipeline_mode = #tpu.pipeline_mode<synchronous>, transform_indices = @transform_8, window_bounds = array<i64: 8, 1>}, {pipeline_mode = #tpu.pipeline_mode<synchronous>, transform_indices = @transform_9, window_bounds = array<i64: 8, 1>}, {pipeline_mode = #tpu.pipeline_mode<synchronous>, transform_indices = @transform_10, window_bounds = array<i64: 8, 1>}, {pipeline_mode = #tpu.pipeline_mode<synchronous>, transform_indices = @transform_11, window_bounds = array<i64: 8, 4>}, {pipeline_mode = #tpu.pipeline_mode<synchronous>, transform_indices = @transform_12, window_bounds = array<i64: 8, 1>}, {pipeline_mode = #tpu.pipeline_mode<synchronous>, transform_indices = @transform_13, window_bounds = array<i64: 8, 392>}, {pipeline_mode = #tpu.pipeline_mode<synchronous>, transform_indices = @transform_14, window_bounds = array<i64: 8, 1>}, {pipeline_mode = #tpu.pipeline_mode<synchronous>, transform_indices = @transform_15, window_bounds = array<i64: 8, 1>}, {pipeline_mode = #tpu.pipeline_mode<synchronous>, transform_indices = @transform_16, window_bounds = array<i64: 8, 1>}, {transform_indices = @transform_17, window_bounds = array<i64: 1, 8, 256>}]} {
    %c0 = arith.constant 0 : index
    %c0_0 = arith.constant 0 : index
    %c0_1 = arith.constant 0 : index
    %0 = vector.load %arg1[%c0, %c0_0, %c0_1] : memref<1x4x256xf32, #tpu.memory_space<vmem>>, vector<1x4x256xf32>
    %1 = vector.shape_cast %0 : vector<1x4x256xf32> to vector<4x256xf32>
    %c0_2 = arith.constant 0 : index
    %c0_3 = arith.constant 0 : index
    %c0_4 = arith.constant 0 : index
    %2 = vector.load %arg2[%c0_2, %c0_3, %c0_4] : memref<1x8x256xf32, #tpu.memory_space<vmem>>, vector<1x8x256xf32>
    %3 = vector.shape_cast %2 : vector<1x8x256xf32> to vector<8x256xf32>
    %c0_5 = arith.constant 0 : index
    %c0_6 = arith.constant 0 : index
    %c0_7 = arith.constant 0 : index
    %4 = vector.load %arg3[%c0_5, %c0_6, %c0_7] : memref<1x392x256xf32, #tpu.memory_space<vmem>>, vector<1x392x256xf32>
    %5 = vector.shape_cast %4 : vector<1x392x256xf32> to vector<392x256xf32>
    %c0_8 = arith.constant 0 : index
    %c0_9 = arith.constant 0 : index
    %6 = vector.load %arg4[%c0_8, %c0_9] : memref<8x4xf32, #tpu.memory_space<vmem>>, vector<8x4xf32>
    %cst = arith.constant dense<0.000000e+00> : vector<8x256xf32>
    %7 = tpu.matmul %6, %1, %cst {dimension_numbers = #tpu.dot_dimension_numbers<[1], [0], [0], [1], [0, 0, 1, 1], [], []>} : vector<8x4xf32>, vector<4x256xf32>, vector<8x256xf32> -> vector<8x256xf32>
    %c0_10 = arith.constant 0 : index
    %c0_11 = arith.constant 0 : index
    %8 = vector.load %arg5[%c0_10, %c0_11] : memref<8x1xf32, #tpu.memory_space<vmem>>, vector<8x1xf32>
    %9 = vector.broadcast %8 : vector<8x1xf32> to vector<8x256xf32>
    %10 = arith.addf %7, %9 : vector<8x256xf32>
    %c0_12 = arith.constant 0 : index
    %c0_13 = arith.constant 0 : index
    %11 = vector.load %arg8[%c0_12, %c0_13] : memref<8x8xf32, #tpu.memory_space<vmem>>, vector<8x8xf32>
    %cst_14 = arith.constant dense<0.000000e+00> : vector<8x256xf32>
    %12 = tpu.matmul %11, %3, %cst_14 {dimension_numbers = #tpu.dot_dimension_numbers<[1], [0], [0], [1], [0, 0, 1, 1], [], []>} : vector<8x8xf32>, vector<8x256xf32>, vector<8x256xf32> -> vector<8x256xf32>
    %c0_15 = arith.constant 0 : index
    %c0_16 = arith.constant 0 : index
    %13 = vector.load %arg9[%c0_15, %c0_16] : memref<8x1xf32, #tpu.memory_space<vmem>>, vector<8x1xf32>
    %14 = vector.broadcast %13 : vector<8x1xf32> to vector<8x256xf32>
    %15 = arith.addf %12, %14 : vector<8x256xf32>
    %c0_17 = arith.constant 0 : index
    %c0_18 = arith.constant 0 : index
    %16 = vector.load %arg6[%c0_17, %c0_18] : memref<8x1xf32, #tpu.memory_space<vmem>>, vector<8x1xf32>
    %c0_19 = arith.constant 0 : index
    %c0_20 = arith.constant 0 : index
    %17 = vector.load %arg7[%c0_19, %c0_20] : memref<8x1xf32, #tpu.memory_space<vmem>>, vector<8x1xf32>
    %18 = vector.shape_cast %10 : vector<8x256xf32> to vector<1x8x256xf32>
    %cst_21 = arith.constant dense<0.000000e+00> : vector<1xf32>
    %19 = vector.multi_reduction <add>, %18, %cst_21 [1, 2] : vector<1x8x256xf32> to vector<1xf32>
    %20 = vector.shape_cast %19 : vector<1xf32> to vector<1x1x1xf32>
    %21 = vector.extract %20[0, 0, 0] : f32 from vector<1x1x1xf32>
    %22 = arith.mulf %10, %10 : vector<8x256xf32>
    %23 = vector.shape_cast %22 : vector<8x256xf32> to vector<1x8x256xf32>
    %cst_22 = arith.constant dense<0.000000e+00> : vector<1xf32>
    %24 = vector.multi_reduction <add>, %23, %cst_22 [1, 2] : vector<1x8x256xf32> to vector<1xf32>
    %25 = vector.shape_cast %24 : vector<1xf32> to vector<1x1x1xf32>
    %26 = vector.extract %25[0, 0, 0] : f32 from vector<1x1x1xf32>
    %cst_23 = arith.constant 4.8828125E-4 : f32
    %27 = arith.mulf %21, %cst_23 : f32
    %cst_24 = arith.constant 4.8828125E-4 : f32
    %28 = arith.mulf %26, %cst_24 : f32
    %29 = arith.mulf %27, %27 : f32
    %30 = arith.subf %28, %29 : f32
    %31 = vector.broadcast %27 : f32 to vector<8x256xf32>
    %32 = arith.subf %10, %31 : vector<8x256xf32>
    %cst_25 = arith.constant 9.99999974E-6 : f32
    %33 = arith.addf %30, %cst_25 : f32
    %34 = math.rsqrt %33 : f32
    %35 = vector.broadcast %34 : f32 to vector<8x256xf32>
    %36 = arith.mulf %32, %35 : vector<8x256xf32>
    %37 = vector.broadcast %16 : vector<8x1xf32> to vector<8x256xf32>
    %38 = arith.mulf %36, %37 : vector<8x256xf32>
    %39 = vector.broadcast %17 : vector<8x1xf32> to vector<8x256xf32>
    %40 = arith.addf %38, %39 : vector<8x256xf32>
    %c0_26 = arith.constant 0 : index
    %c0_27 = arith.constant 0 : index
    %41 = vector.load %arg10[%c0_26, %c0_27] : memref<8x1xf32, #tpu.memory_space<vmem>>, vector<8x1xf32>
    %c0_28 = arith.constant 0 : index
    %c0_29 = arith.constant 0 : index
    %42 = vector.load %arg11[%c0_28, %c0_29] : memref<8x1xf32, #tpu.memory_space<vmem>>, vector<8x1xf32>
    %43 = vector.shape_cast %15 : vector<8x256xf32> to vector<1x8x256xf32>
    %cst_30 = arith.constant dense<0.000000e+00> : vector<1xf32>
    %44 = vector.multi_reduction <add>, %43, %cst_30 [1, 2] : vector<1x8x256xf32> to vector<1xf32>
    %45 = vector.shape_cast %44 : vector<1xf32> to vector<1x1x1xf32>
    %46 = vector.extract %45[0, 0, 0] : f32 from vector<1x1x1xf32>
    %47 = arith.mulf %15, %15 : vector<8x256xf32>
    %48 = vector.shape_cast %47 : vector<8x256xf32> to vector<1x8x256xf32>
    %cst_31 = arith.constant dense<0.000000e+00> : vector<1xf32>
    %49 = vector.multi_reduction <add>, %48, %cst_31 [1, 2] : vector<1x8x256xf32> to vector<1xf32>
    %50 = vector.shape_cast %49 : vector<1xf32> to vector<1x1x1xf32>
    %51 = vector.extract %50[0, 0, 0] : f32 from vector<1x1x1xf32>
    %cst_32 = arith.constant 4.8828125E-4 : f32
    %52 = arith.mulf %46, %cst_32 : f32
    %cst_33 = arith.constant 4.8828125E-4 : f32
    %53 = arith.mulf %51, %cst_33 : f32
    %54 = arith.mulf %52, %52 : f32
    %55 = arith.subf %53, %54 : f32
    %56 = vector.broadcast %52 : f32 to vector<8x256xf32>
    %57 = arith.subf %15, %56 : vector<8x256xf32>
    %cst_34 = arith.constant 9.99999974E-6 : f32
    %58 = arith.addf %55, %cst_34 : f32
    %59 = math.rsqrt %58 : f32
    %60 = vector.broadcast %59 : f32 to vector<8x256xf32>
    %61 = arith.mulf %57, %60 : vector<8x256xf32>
    %62 = vector.broadcast %41 : vector<8x1xf32> to vector<8x256xf32>
    %63 = arith.mulf %61, %62 : vector<8x256xf32>
    %64 = vector.broadcast %42 : vector<8x1xf32> to vector<8x256xf32>
    %65 = arith.addf %63, %64 : vector<8x256xf32>
    %66 = arith.addf %40, %65 : vector<8x256xf32>
    %67 = arith.negf %66 : vector<8x256xf32>
    %68 = math.exp %67 : vector<8x256xf32>
    %cst_35 = arith.constant 1.000000e+00 : f32
    %69 = vector.broadcast %cst_35 : f32 to vector<8x256xf32>
    %70 = arith.addf %69, %68 : vector<8x256xf32>
    %71 = arith.divf %69, %70 : vector<8x256xf32>
    %c0_36 = arith.constant 0 : index
    %c0_37 = arith.constant 0 : index
    %72 = vector.load %arg12[%c0_36, %c0_37] : memref<8x4xf32, #tpu.memory_space<vmem>>, vector<8x4xf32>
    %cst_38 = arith.constant dense<0.000000e+00> : vector<8x256xf32>
    %73 = tpu.matmul %72, %1, %cst_38 {dimension_numbers = #tpu.dot_dimension_numbers<[1], [0], [0], [1], [0, 0, 1, 1], [], []>} : vector<8x4xf32>, vector<4x256xf32>, vector<8x256xf32> -> vector<8x256xf32>
    %c0_39 = arith.constant 0 : index
    %c0_40 = arith.constant 0 : index
    %74 = vector.load %arg13[%c0_39, %c0_40] : memref<8x1xf32, #tpu.memory_space<vmem>>, vector<8x1xf32>
    %75 = vector.broadcast %74 : vector<8x1xf32> to vector<8x256xf32>
    %76 = arith.addf %73, %75 : vector<8x256xf32>
    %c0_41 = arith.constant 0 : index
    %c0_42 = arith.constant 0 : index
    %77 = vector.load %arg14[%c0_41, %c0_42] : memref<8x392xf32, #tpu.memory_space<vmem>>, vector<8x392xf32>
    %cst_43 = arith.constant dense<0.000000e+00> : vector<8x256xf32>
    %78 = tpu.matmul %77, %5, %cst_43 {dimension_numbers = #tpu.dot_dimension_numbers<[1], [0], [0], [1], [0, 0, 1, 1], [], []>} : vector<8x392xf32>, vector<392x256xf32>, vector<8x256xf32> -> vector<8x256xf32>
    %c0_44 = arith.constant 0 : index
    %c0_45 = arith.constant 0 : index
    %79 = vector.load %arg15[%c0_44, %c0_45] : memref<8x1xf32, #tpu.memory_space<vmem>>, vector<8x1xf32>
    %80 = vector.broadcast %79 : vector<8x1xf32> to vector<8x256xf32>
    %81 = arith.addf %78, %80 : vector<8x256xf32>
    %82 = arith.addf %76, %81 : vector<8x256xf32>
    %cst_46 = arith.constant 0.000000e+00 : f32
    %83 = vector.broadcast %cst_46 : f32 to vector<8x256xf32>
    %84 = arith.maximumf %82, %83 : vector<8x256xf32>
    %85 = arith.mulf %71, %84 : vector<8x256xf32>
    %cst_47 = arith.constant 1.000000e+00 : f32
    %86 = vector.broadcast %cst_47 : f32 to vector<8x256xf32>
    %87 = arith.subf %86, %71 : vector<8x256xf32>
    %88 = arith.mulf %87, %3 : vector<8x256xf32>
    %89 = arith.addf %85, %88 : vector<8x256xf32>
    %c0_48 = arith.constant 0 : index
    %c0_49 = arith.constant 0 : index
    %90 = vector.load %arg16[%c0_48, %c0_49] : memref<8x1xf32, #tpu.memory_space<vmem>>, vector<8x1xf32>
    %c0_50 = arith.constant 0 : index
    %c0_51 = arith.constant 0 : index
    %91 = vector.load %arg17[%c0_50, %c0_51] : memref<8x1xf32, #tpu.memory_space<vmem>>, vector<8x1xf32>
    %92 = vector.shape_cast %89 : vector<8x256xf32> to vector<1x8x256xf32>
    %cst_52 = arith.constant dense<0.000000e+00> : vector<1xf32>
    %93 = vector.multi_reduction <add>, %92, %cst_52 [1, 2] : vector<1x8x256xf32> to vector<1xf32>
    %94 = vector.shape_cast %93 : vector<1xf32> to vector<1x1x1xf32>
    %95 = vector.extract %94[0, 0, 0] : f32 from vector<1x1x1xf32>
    %96 = arith.mulf %89, %89 : vector<8x256xf32>
    %97 = vector.shape_cast %96 : vector<8x256xf32> to vector<1x8x256xf32>
    %cst_53 = arith.constant dense<0.000000e+00> : vector<1xf32>
    %98 = vector.multi_reduction <add>, %97, %cst_53 [1, 2] : vector<1x8x256xf32> to vector<1xf32>
    %99 = vector.shape_cast %98 : vector<1xf32> to vector<1x1x1xf32>
    %100 = vector.extract %99[0, 0, 0] : f32 from vector<1x1x1xf32>
    %cst_54 = arith.constant 4.8828125E-4 : f32
    %101 = arith.mulf %95, %cst_54 : f32
    %cst_55 = arith.constant 4.8828125E-4 : f32
    %102 = arith.mulf %100, %cst_55 : f32
    %103 = arith.mulf %101, %101 : f32
    %104 = arith.subf %102, %103 : f32
    %105 = vector.broadcast %101 : f32 to vector<8x256xf32>
    %106 = arith.subf %89, %105 : vector<8x256xf32>
    %cst_56 = arith.constant 9.99999974E-6 : f32
    %107 = arith.addf %104, %cst_56 : f32
    %108 = math.rsqrt %107 : f32
    %109 = vector.broadcast %108 : f32 to vector<8x256xf32>
    %110 = arith.mulf %106, %109 : vector<8x256xf32>
    %111 = vector.broadcast %90 : vector<8x1xf32> to vector<8x256xf32>
    %112 = arith.mulf %110, %111 : vector<8x256xf32>
    %113 = vector.broadcast %91 : vector<8x1xf32> to vector<8x256xf32>
    %114 = arith.addf %112, %113 : vector<8x256xf32>
    %cst_57 = arith.constant 0.000000e+00 : f32
    %115 = vector.broadcast %cst_57 : f32 to vector<8x256xf32>
    %116 = arith.maximumf %114, %115 : vector<8x256xf32>
    %c0_58 = arith.constant 0 : index
    %c0_59 = arith.constant 0 : index
    %c0_60 = arith.constant 0 : index
    %117 = vector.load %arg18[%c0_58, %c0_59, %c0_60] : memref<1x8x256xf32, #tpu.memory_space<vmem>>, vector<1x8x256xf32>
    %118 = vector.shape_cast %117 : vector<1x8x256xf32> to vector<8x256xf32>
    %119 = vector.shape_cast %116 : vector<8x256xf32> to vector<1x8x256xf32>
    tpu.vector_store %arg18[%c0_58, %c0_59, %c0_60], %119 {strides = array<i32>} : memref<1x8x256xf32, #tpu.memory_space<vmem>>, vector<1x8x256xf32>,
    return
  }
  func.func @transform_0(%arg0: i32) -> (i32, i32, i32) {
    %c0_i32 = arith.constant 0 : i32
    %c0_i32_0 = arith.constant 0 : i32
    %c0_i32_1 = arith.constant 0 : i32
    return %arg0, %c0_i32, %c0_i32_0 : i32, i32, i32
  }
  func.func @transform_1(%arg0: i32) -> (i32, i32, i32) {
    %c0_i32 = arith.constant 0 : i32
    %c0_i32_0 = arith.constant 0 : i32
    %c0_i32_1 = arith.constant 0 : i32
    return %arg0, %c0_i32, %c0_i32_0 : i32, i32, i32
  }
  func.func @transform_2(%arg0: i32) -> (i32, i32, i32) {
    %c0_i32 = arith.constant 0 : i32
    %c0_i32_0 = arith.constant 0 : i32
    %c0_i32_1 = arith.constant 0 : i32
    return %arg0, %c0_i32, %c0_i32_0 : i32, i32, i32
  }
  func.func @transform_3(%arg0: i32) -> (i32, i32) {
    %c0_i32 = arith.constant 0 : i32
    %c0_i32_0 = arith.constant 0 : i32
    %c0_i32_1 = arith.constant 0 : i32
    return %c0_i32, %c0_i32_0 : i32, i32
  }
  func.func @transform_4(%arg0: i32) -> (i32, i32) {
    %c0_i32 = arith.constant 0 : i32
    %c0_i32_0 = arith.constant 0 : i32
    %c0_i32_1 = arith.constant 0 : i32
    return %c0_i32, %c0_i32_0 : i32, i32
  }
  func.func @transform_5(%arg0: i32) -> (i32, i32) {
    %c0_i32 = arith.constant 0 : i32
    %c0_i32_0 = arith.constant 0 : i32
    %c0_i32_1 = arith.constant 0 : i32
    return %c0_i32, %c0_i32_0 : i32, i32
  }
  func.func @transform_6(%arg0: i32) -> (i32, i32) {
    %c0_i32 = arith.constant 0 : i32
    %c0_i32_0 = arith.constant 0 : i32
    %c0_i32_1 = arith.constant 0 : i32
    return %c0_i32, %c0_i32_0 : i32, i32
  }
  func.func @transform_7(%arg0: i32) -> (i32, i32) {
    %c0_i32 = arith.constant 0 : i32
    %c0_i32_0 = arith.constant 0 : i32
    %c0_i32_1 = arith.constant 0 : i32
    return %c0_i32, %c0_i32_0 : i32, i32
  }
  func.func @transform_8(%arg0: i32) -> (i32, i32) {
    %c0_i32 = arith.constant 0 : i32
    %c0_i32_0 = arith.constant 0 : i32
    %c0_i32_1 = arith.constant 0 : i32
    return %c0_i32, %c0_i32_0 : i32, i32
  }
  func.func @transform_9(%arg0: i32) -> (i32, i32) {
    %c0_i32 = arith.constant 0 : i32
    %c0_i32_0 = arith.constant 0 : i32
    %c0_i32_1 = arith.constant 0 : i32
    return %c0_i32, %c0_i32_0 : i32, i32
  }
  func.func @transform_10(%arg0: i32) -> (i32, i32) {
    %c0_i32 = arith.constant 0 : i32
    %c0_i32_0 = arith.constant 0 : i32
    %c0_i32_1 = arith.constant 0 : i32
    return %c0_i32, %c0_i32_0 : i32, i32
  }
  func.func @transform_11(%arg0: i32) -> (i32, i32) {
    %c0_i32 = arith.constant 0 : i32
    %c0_i32_0 = arith.constant 0 : i32
    %c0_i32_1 = arith.constant 0 : i32
    return %c0_i32, %c0_i32_0 : i32, i32
  }
  func.func @transform_12(%arg0: i32) -> (i32, i32) {
    %c0_i32 = arith.constant 0 : i32
    %c0_i32_0 = arith.constant 0 : i32
    %c0_i32_1 = arith.constant 0 : i32
    return %c0_i32, %c0_i32_0 : i32, i32
  }
  func.func @transform_13(%arg0: i32) -> (i32, i32) {
    %c0_i32 = arith.constant 0 : i32
    %c0_i32_0 = arith.constant 0 : i32
    %c0_i32_1 = arith.constant 0 : i32
    return %c0_i32, %c0_i32_0 : i32, i32
  }
  func.func @transform_14(%arg0: i32) -> (i32, i32) {
    %c0_i32 = arith.constant 0 : i32
    %c0_i32_0 = arith.constant 0 : i32
    %c0_i32_1 = arith.constant 0 : i32
    return %c0_i32, %c0_i32_0 : i32, i32
  }
  func.func @transform_15(%arg0: i32) -> (i32, i32) {
    %c0_i32 = arith.constant 0 : i32
    %c0_i32_0 = arith.constant 0 : i32
    %c0_i32_1 = arith.constant 0 : i32
    return %c0_i32, %c0_i32_0 : i32, i32
  }
  func.func @transform_16(%arg0: i32) -> (i32, i32) {
    %c0_i32 = arith.constant 0 : i32
    %c0_i32_0 = arith.constant 0 : i32
    %c0_i32_1 = arith.constant 0 : i32
    return %c0_i32, %c0_i32_0 : i32, i32
  }
  func.func @transform_17(%arg0: i32) -> (i32, i32, i32) {
    %c0_i32 = arith.constant 0 : i32
    %c0_i32_0 = arith.constant 0 : i32
    %c0_i32_1 = arith.constant 0 : i32
    return %arg0, %c0_i32, %c0_i32_0 : i32, i32, i32
  }
}

</mosaic_0001>

<bundles_post_ra>
// kernel: tpu_custom_call.1
= control target key start
LH: loop header
LB: loop body
LE: loop exit
PB: predicated region body
PF: predicated region fallthrough
CT: control target
= control target key end

     0   :  { %s2200_s0 = inlined_call_operand.vmem [shape: f32[2,4,256], index: 0, kind: input, shape index: {}]   ;;  %s2201_s1 = inlined_call_operand.vmem [shape: f32[2,8,256], index: 1, kind: input, shape index: {}]   ;;  %s2202_s2 = inlined_call_operand.hbm [shape: f32[2,392,256], index: 2, kind: input, shape index: {}]   ;;  %s2203_s3 = inlined_call_operand.vmem [shape: f32[8,4], index: 3, kind: input, shape index: {}]   ;;  %s2204_s4 = inlined_call_operand.vmem [shape: f32[8,1], index: 4, kind: input, shape index: {}]   ;;  %s2205_s5 = inlined_call_operand.vmem [shape: f32[8,1], index: 5, kind: input, shape index: {}]   ;;  %s2206_s6 = inlined_call_operand.vmem [shape: f32[8,1], index: 6, kind: input, shape index: {}]   ;;  %s2207_s7 = inlined_call_operand.vmem [shape: f32[8,8], index: 7, kind: input, shape index: {}]   ;;  %s2208_s8 = inlined_call_operand.vmem [shape: f32[8,1], index: 8, kind: input, shape index: {}]   ;;  %s2209_s9 = inlined_call_operand.vmem [shape: f32[8,1], index: 9, kind: input, shape index: {}]   ;;  %s2210_s10 = inlined_call_operand.vmem [shape: f32[8,1], index: 10, kind: input, shape index: {}]   ;;  %s2211_s11 = inlined_call_operand.vmem [shape: f32[8,4], index: 11, kind: input, shape index: {}]   ;;  %s2212_s12 = inlined_call_operand.vmem [shape: f32[8,1], index: 12, kind: input, shape index: {}]   ;;  %s2213_s13 = inlined_call_operand.vmem [shape: f32[8,392], index: 13, kind: input, shape index: {}]   ;;  %s2214_s14 = inlined_call_operand.vmem [shape: f32[8,1], index: 14, kind: input, shape index: {}]   ;;  %s2215_s15 = inlined_call_operand.vmem [shape: f32[8,1], index: 15, kind: input, shape index: {}]   ;;  %s2216_s16 = inlined_call_operand.vmem [shape: f32[8,1], index: 16, kind: input, shape index: {}]   ;;  %s2217_s17 = inlined_call_operand.hbm [shape: f32[2,8,256], index: 17, kind: output, shape index: {}]  }
   0x1   :  { %2227 = sst [smem:[#allocation14_spill]] %s2200_s0 }
   0x2   :  { %2228 = sst [smem:[#allocation15_spill]] %s2201_s1 }
   0x3   :  { %2229 = sst [smem:[#allocation16_spill]] %s2202_s2 }
   0x4   :  { %2230 = sst [smem:[#allocation17_spill]] %s2215_s15 }
   0x5   :  { %2231 = sst [smem:[#allocation18_spill]] %s2217_s17 }
   0x6   :  { %22 = vsyncpa [#allocation3], 0 }
   0x7   :  { %24 = vsyncpa [#allocation3 + $0x1], 0 }
   0x8   :  { %25 = vsyncpa [#allocation4], 0 }
   0x9   :  { %27 = vsyncpa [#allocation4 + $0x1], 0  ;;  %s1824_s24 = smov 0   ;;  %s1826_s25 = smov 0  }
   0xa   :  { %s1828_s26 = smov 0   ;;  %s1830_s27 = smov 0  }
   0xb LB: > { %2232 = sst [smem:[#allocation8_spill]] %s1714_s24  ;;  %s1845_s28 = sadd.s32 4294967295, %s1726_s27   ;;  %s1726_s27 = sphi %s1830_s27, %s2253_s27   ;;  %s1722_s26 = sphi %s1828_s26, %s2258_s26   ;;  %s1718_s25 = sphi %s1826_s25, %s2257_s25   ;;  %s1714_s24 = sphi %s1824_s24, %s2256_s24  }
   0xc   : > { %2233 = sst [smem:[#allocation9_spill]] %s1722_s26  ;;  %s1410_s29 = sadd.s32 4294967294, %s1726_s27  }
   0xd   : > { %s1849_s0 = sadd.s32 1, %s1726_s27   ;;  %s92_s30 = sadd.s32 1, %s1722_s26 }
   0xe   : > { %2234 = sst [smem:[#allocation10_spill]] %s1849_s0  ;;  %s89_s18 = ssub.s32 %s1726_s27, %s1849_s0 }
   0xf   : > { %p99_p0 = scmp.ne.s32.totalorder %s1722_s26, %s1718_s25  ;;  %p90_p1 = scmp.eq.s32.totalorder %s89_s18, 0 }
  0x10   : > { %p100_p2 = scmp.eq.s32.totalorder %s1726_s27, 0  ;;  %p105_p3 = scmp.ne.s32.totalorder %s1718_s25, %s1714_s24 }
  0x11   : > { %p106_p4 = scmp.eq.s32.totalorder %s1845_s28, 0  ;;  %p423_p7 = scmp.eq.s32.totalorder %s1845_s28, 1 }
  0x12   : > { %s1861_s19 = scalar_select %p90_p1, %s1722_s26, %s92_s30  }
  0x13   : > { %p101_p5 = por %p100_p2, %p99_p0  ;;  %p1863_p6 = por %p106_p4, %p105_p3 }
  0x14   : > { %2235 = sst [smem:[#allocation11_spill]] %s1861_s19  ;;  %p429_p8 = scmp.eq.s32.totalorder %s1410_s29, 1 }
  0x15   : > { %p1575_p10 = scmp.lt.s32.totalorder %s1726_s27, 2  ;;  %p1870_p11 = por %p423_p7, %p99_p0 }
  0x16   : > { %p1874_p12 = por %p429_p8, %p105_p3  ;;  %s507_s22 = sand.u32 1, %s1722_s26  }
  0x17   : > { %s2237_s20 = scalar_select %p1870_p11, 1, 0 }
  0x18   : > { %s2239_s21 = scalar_select %p1874_p12, 1, 0 }
  0x19   : > { %2238 = sst [smem:[#allocation12_spill]] %s2237_s20  ;;  %s1543_s23 = smul.u32 12544, %s1726_s27 }
  0x1a   : > { %2240 = sst [smem:[#allocation13_spill]] %s2239_s21  ;;  %s1542_s30 = smul.u32 784, %s507_s22 }
  0x1b   : > { %s2241_s2 = sld [smem:[#allocation16_spill]]  ;;  %p1885_p13 = pnand %p1575_p10, %p101_p5 }
  0x1c   : > { %s511_s24 = scalar_lea.vmem [#allocation2], %s1542_s30  ;;  %s1891_s26 = scalar_lea.sflag [#allocation3], %s507_s22 }
  0x1d   : > { %s518_s21 = sshll.u32 %s511_s24, 4  ;;  %p1632_p1 = pneg %p1885_p13  ;;  %s1889_s21 = int_to_ptr.vmem [resolvable:$true] %s518_s21 }
  0x21   : > { %s1883_s0 = scalar_lea.hbm %s2241_s2, %s1543_s23  ;;  %s1635_s18 = scalar_lea.hbm %s2241_s2, 25088 }
  0x22   : > { %s1630_s17 = scalar_lea.hbm %s1883_s0, 12544  ;;  %p1636_p4 = scmp.lt.u32.totalorder %s1883_s0, %s2241_s2 }
  0x23   : > { %p1631_p0 = scmp.ne.s32.totalorder %s1883_s0, %s1630_s17  ;;  %p1637_p5 = scmp.lt.u32.totalorder %s1635_s18, %s1630_s17 }
  0x24   : > { %p1639_p8 = scmp.lt.u32.totalorder %s1630_s17, %s1883_s0 }
  0x25   : > { %p1633_p2 = pnand %p1632_p1, %p1631_p0  ;;  %p1638_p7 = por %p1637_p5, %p1636_p4 }
  0x27   : > { %p1634_p3 = pneg %p1633_p2  ;;  %p1640_p10 = por %p1639_p8, %p1638_p7 }
  0x29   : > { %p1641_p9 = pnand %p1640_p10, %p1634_p3 }
  0x2b   : > { %1644 = shalt.err (!%p1641_p9)
}
  0x2c   : > { %s1645_s24 = scalar_lea.vmem %s1889_s21, 12544  ;;  %s1728_s22 = smov [#allocation2]  }
  0x2d   : > { %p1646_p0 = scmp.ne.s32.totalorder %s1889_s21, %s1645_s24  ;;  %s1650_s30 = sshll.u32 %s1728_s22, 4  ;;  %s1651_s30 = int_to_ptr.vmem [resolvable:$false] %s1650_s30 }
  0x2e   : > { %s1652_s15 = scalar_lea.vmem %s1651_s30, 25088  ;;  %p1653_p11 = scmp.lt.s32.totalorder %s1889_s21, %s1651_s30 }
  0x2f   : > { %p1648_p2 = pnand %p1646_p0, %p1632_p1  ;;  %p1654_p4 = scmp.lt.s32.totalorder %s1652_s15, %s1645_s24 }
  0x31   : > { %p1649_p12 = pneg %p1648_p2  ;;  %p1655_p5 = por %p1654_p4, %p1653_p11 }
  0x33   : > { %p1656_p7 = pnand %p1655_p5, %p1649_p12 }
  0x35   : > { %1659 = shalt.err (!%p1656_p7)
}
  0x36   : > { %s1729_s17 = smov 256   ;;  %s1730_s20 = smov 16  }
  0x37   : > { %1570 = dma.hbm_to_vmem [thread:$0]  (!%p1885_p13), %s1883_s0, 12544, %s1889_s21, %s1891_s26, %s1729_s17, %s1729_s17, %s1730_s20  }
  0x38   : > { %p1414_p9 = scmp.ge.s32.totalorder %s1726_s27, 1  ;;  %p526_p1 = scmp.lt.s32.totalorder %s1726_s27, 3 }
  0x3a   : > { %p527_p3 = pnand %p1414_p9, %p526_p1 }
  0x3b   : > { %s1922_s19 = sand.u32 (!%p527_p3), 1, %s1718_s25  }
  0x3c   : > { %530 = sbr.rel (%p527_p3) target bundleno = 985 (0x3d9), region = 88  ;;  %s533_s18 = scalar_lea.sflag (!%p527_p3), [#allocation3], %s1922_s19 }
  0x3d   : > { %s1544_s23 = smul.u32 (!%p527_p3), 784, %s1922_s19 }
  0x3f   : > { %s1926_s24 = scalar_lea.vmem (!%p527_p3), [#allocation2], %s1544_s23 }
  0x43   : > { %1705 = dma.done.wait (%p1863_p6), %s533_s18, 12544  }
  0x44   : > { %1707 = vsyncadd (%p1863_p6), %s533_s18, 4294954752  ;;  %p597_p11 = scmp.lt.s32.totalorder %s1845_s28, 1  ;;  %v1731_v0 = vmov 0.0   ;;  %v1732_v1 = vmov 0   ;;  %s2243_s30 = sld [smem:[#allocation14_spill]]  ;;  %vm721_vm0 = vcmask 1043456  }
  0x45   : > { %790 = vmatprep.mubr.f32.mxu0 %v1731_v0  ;;  %1613 = vset.pattern.permute.xlu0 %v1732_v1  ;;  %s2244_s20 = sld [smem:[#allocation15_spill]]  ;;  %v708_v3 = vld [vmem:[%s2203_s3] sm:$0xff]  ;;  %vm717_vm1 = vcmask 31744   ;;  %v611_v9 = vld [vmem:[%s1926_s24 + $0x8] sm:$0xff]  ;;  %v613_v10 = vld [vmem:[%s1926_s24 + $0x18] sm:$0xff]  ;;  %vm804_vm2 = vcmask 64512  }
  0x46   : > { %s598_s26 = scalar_select %p597_p11, %s1845_s28, 1  ;;  %1614 = vset.pattern.permute.xlu1 %v1732_v1  ;;  %v709_v7 = vld [vmem:[%s2204_s4] sm:$0xff]  ;;  %v1438_v11 = vpack.c.bf16 %v613_v10, %v611_v9  ;;  %v615_v14 = vld [vmem:[%s1926_s24 + $0x28] sm:$0xff]  ;;  %v617_v16 = vld [vmem:[%s1926_s24 + $0x38] sm:$0xff] }
  0x47   : > { %712 = vperm.xlu0 %1613, %v709_v7   ;;  %v798_v8 = vld [vmem:[%s2208_s8] sm:$0xff]  ;;  %v1442_v17 = vpack.c.bf16 %v617_v16, %v615_v14  ;;  %v619_v21 = vld [vmem:[%s1926_s24 + $0x48] sm:$0xff]  ;;  %v621_v22 = vld [vmem:[%s1926_s24 + $0x58] sm:$0xff] }
  0x48   : > { %s1435_s0 = sshll.u32 %s598_s26, 3  ;;  %s1436_s21 = sshll.u32 %s598_s26, 4  ;;  %801 = vperm.xlu1 %1614, %v798_v8   ;;  %v610_v12 = vld [vmem:[%s1926_s24] sm:$0xff]  ;;  %v612_v13 = vld [vmem:[%s1926_s24 + $0x10] sm:$0xff]  ;;  %1439 = vmatprep.subr.bf16.mxu1 %v1438_v11  ;;  %v1446_v24 = vpack.c.bf16 %v621_v22, %v619_v21  ;;  %v623_v27 = vld [vmem:[%s1926_s24 + $0x68] sm:$0xff] }
  0x49   : > { %v1440_v15 = vpack.c.bf16 %v612_v13, %v610_v12  ;;  %v614_v18 = vld [vmem:[%s1926_s24 + $0x20] sm:$0xff]  ;;  %v616_v19 = vld [vmem:[%s1926_s24 + $0x30] sm:$0xff]  ;;  %v625_v28 = vld [vmem:[%s1926_s24 + $0x78] sm:$0xff] }
  0x4a   : > { %s601_s15 = scalar_lea.vmem %s2243_s30, %s1435_s0  ;;  %v797_v20 = vld [vmem:[%s2207_s7] sm:$0xff]  ;;  %v1444_v23 = vpack.c.bf16 %v616_v19, %v614_v18  ;;  %v1450_v31 = vpack.c.bf16 %v625_v28, %v623_v27  ;;  %v627_v33 = vld [vmem:[%s1926_s24 + $0x88] sm:$0xff]  ;;  %v629_v35 = vld [vmem:[%s1926_s24 + $0x98] sm:$0xff] }
  0x4b   : > { %s606_s23 = scalar_lea.vmem %s2244_s20, %s1436_s21  ;;  %v607_v2 = vld [vmem:[%s601_s15] sm:$0xff]  ;;  %1441 = vmatpush1.bf16.msra.mxu1 %v1440_v15  ;;  %v675_v34 = vld [vmem:[%s1926_s24 + $0x208] sm:$0xff]  ;;  %v677_v36 = vld [vmem:[%s1926_s24 + $0x218] sm:$0xff]  ;;  %v1454_v45 = vpack.c.bf16 %v629_v35, %v627_v33 }
  0x4c   : > { %v716_v4 = vcombine.high %v607_v2, %v607_v2  ;;  %v1943_v5 = vld [vmem:[%s606_s23 + $0x8] sm:$0xff]  ;;  %v1945_v6 = vld [vmem:[%s606_s23] sm:$0xff]  ;;  %1443 = vmatprep.subr.bf16.mxu1 %v1442_v17  ;;  %v1502_v38 = vpack.c.bf16 %v677_v36, %v675_v34 }
  0x4d   : > { %v618_v25 = vld [vmem:[%s1926_s24 + $0x40] sm:$0xff]  ;;  %v620_v26 = vld [vmem:[%s1926_s24 + $0x50] sm:$0xff]  ;;  %v679_v44 = vld [vmem:[%s1926_s24 + $0x228] sm:$0xff] }
  0x4e   : > { %1420 = vmatprep.subr.msk.mxu0 %vm721_vm0, %v716_v4  ;;  %v1448_v29 = vpack.c.bf16 %v620_v26, %v618_v25  ;;  %v622_v30 = vld [vmem:[%s1926_s24 + $0x60] sm:$0xff]  ;;  %v624_v32 = vld [vmem:[%s1926_s24 + $0x70] sm:$0xff]  ;;  %v631_v47 = vld [vmem:[%s1926_s24 + $0xa8] sm:$0xff] }
  0x4f   : > { %1421 = vmatpush1.msk.msra.mxu0 %vm721_vm0, %v607_v2  ;;  %1445 = vmatpush1.bf16.msra.mxu1 %v1444_v23  ;;  %v997_v37 = vld [vmem:[%s2211_s11] sm:$0xff]  ;;  %v1452_v41 = vpack.c.bf16 %v624_v32, %v622_v30  ;;  %v681_v48 = vld [vmem:[%s1926_s24 + $0x238] sm:$0xff]  ;;  %v683_v54 = vld [vmem:[%s1926_s24 + $0x248] sm:$0xff] }
  0x50   : > { %1422 = vmatmul.mubr.msk.f32.vlgmr.msra.gmra.mrb[0].mxu0 %vm717_vm1, %v708_v3  ;;  %808 = vmatprep.subr.mxu0 %v1943_v5  ;;  %v674_v39 = vld [vmem:[%s1926_s24 + $0x200] sm:$0xff]  ;;  %v676_v40 = vld [vmem:[%s1926_s24 + $0x210] sm:$0xff]  ;;  %v633_v49 = vld [vmem:[%s1926_s24 + $0xb8] sm:$0xff]  ;;  %v1506_v50 = vpack.c.bf16 %v681_v48, %v679_v44 }
  0x51   : > { %809 = vmatpush1.msra.mxu0 %v1945_v6  ;;  %872 = vmatprep.mubr.f32.mxu0 %v1731_v0  ;;  %v626_v42 = vld [vmem:[%s1926_s24 + $0x80] sm:$0xff]  ;;  %v1504_v43 = vpack.c.bf16 %v676_v40, %v674_v39  ;;  %v628_v46 = vld [vmem:[%s1926_s24 + $0x90] sm:$0xff]  ;;  %v685_v55 = vld [vmem:[%s1926_s24 + $0x258] sm:$0xff]  ;;  %v1458_v60 = vpack.c.bf16 %v633_v49, %v631_v47 }
  0x52   : > { %1426 = vmatprep.subr.msk.mxu0 %vm721_vm0, %v716_v4  ;;  %1447 = vmatprep.subr.bf16.mxu1 %v1446_v24  ;;  %v678_v51 = vld [vmem:[%s1926_s24 + $0x220] sm:$0xff]  ;;  %v680_v52 = vld [vmem:[%s1926_s24 + $0x230] sm:$0xff]  ;;  %v1456_v56 = vpack.c.bf16 %v628_v46, %v626_v42  ;;  %v1510_v58 = vpack.c.bf16 %v685_v55, %v683_v54  ;;  %v635_v62 = vld [vmem:[%s1926_s24 + $0xc8] sm:$0xff] }
  0x53   : > { %1449 = vmatpush1.bf16.msra.mxu1 %v1448_v29  ;;  %v1508_v53 = vpack.c.bf16 %v680_v52, %v678_v51  ;;  %v630_v57 = vld [vmem:[%s1926_s24 + $0xa0] sm:$0xff]  ;;  %v632_v61 = vld [vmem:[%s1926_s24 + $0xb0] sm:$0xff]  ;;  %v689_v3 = vld [vmem:[%s1926_s24 + $0x278] sm:$0xff] }
  0x54   : > { %1423 = vmatmul.mubr.msk.f32.vlgmr.msra.gmra.mrb[2].mxu0 %vm804_vm2, %v797_v20  ;;  %1451 = vmatprep.subr.bf16.mxu1 %v1450_v31  ;;  %v682_v59 = vld [vmem:[%s1926_s24 + $0x240] sm:$0xff]  ;;  %v684_v63 = vld [vmem:[%s1926_s24 + $0x250] sm:$0xff]  ;;  %v1460_v9 = vpack.c.bf16 %v632_v61, %v630_v57  ;;  %v691_v10 = vld [vmem:[%s1926_s24 + $0x288] sm:$0xff] }
  0x55   : > { %1427 = vmatpush1.msk.msra.mxu0 %vm721_vm0, %v607_v2  ;;  %1071 = vmatprep.mubr.f32.mxu0 %v1731_v0  ;;  %v637_v0 = vld [vmem:[%s1926_s24 + $0xd8] sm:$0xff]  ;;  %v1512_v1 = vpack.c.bf16 %v684_v63, %v682_v59  ;;  %v687_v2 = vld [vmem:[%s1926_s24 + $0x268] sm:$0xff]  ;;  %v686_v7 = vld [vmem:[%s1926_s24 + $0x260] sm:$0xff] }
  0x56   : > { %1503 = vmatprep.subr.bf16.mxu0 %v1502_v38  ;;  %v1514_v4 = vpack.c.bf16 %v689_v3, %v687_v2  ;;  %v688_v8 = vld [vmem:[%s1926_s24 + $0x270] sm:$0xff]  ;;  %v1462_v11 = vpack.c.bf16 %v637_v0, %v635_v62  ;;  %v634_v12 = vld [vmem:[%s1926_s24 + $0xc0] sm:$0xff]  ;;  %v693_v14 = vld [vmem:[%s1926_s24 + $0x298] sm:$0xff] }
  0x57   : > { %1453 = vmatpush1.bf16.msra.mxu1 %v1452_v41  ;;  %v636_v13 = vld [vmem:[%s1926_s24 + $0xd0] sm:$0xff]  ;;  %v639_v15 = vld [vmem:[%s1926_s24 + $0xe8] sm:$0xff]  ;;  %v641_v16 = vld [vmem:[%s1926_s24 + $0xf8] sm:$0xff]  ;;  %v1516_v17 = vpack.c.bf16 %v688_v8, %v686_v7  ;;  %v1518_v18 = vpack.c.bf16 %v693_v14, %v691_v10 }
  0x58   : > { %1428 = vmatmul.mubr.msk.f32.vlgmr.msra.gmra.mrb[4].mxu0 %vm717_vm1, %v997_v37  ;;  %1455 = vmatprep.subr.bf16.mxu1 %v1454_v45  ;;  %v690_v19 = vld [vmem:[%s1926_s24 + $0x280] sm:$0xff]  ;;  %v692_v20 = vld [vmem:[%s1926_s24 + $0x290] sm:$0xff]  ;;  %v1464_v21 = vpack.c.bf16 %v636_v13, %v634_v12  ;;  %v695_v22 = vld [vmem:[%s1926_s24 + $0x2a8] sm:$0xff]  ;;  %v1466_v24 = vpack.c.bf16 %v641_v16, %v639_v15 }
  0x59   : > { %1505 = vmatpush1.bf16.msra.mxu0 %v1504_v43  ;;  %v697_v23 = vld [vmem:[%s1926_s24 + $0x2b8] sm:$0xff]  ;;  %v638_v25 = vld [vmem:[%s1926_s24 + $0xe0] sm:$0xff]  ;;  %v640_v26 = vld [vmem:[%s1926_s24 + $0xf0] sm:$0xff]  ;;  %v1520_v29 = vpack.c.bf16 %v692_v20, %v690_v19 }
  0x5a   : > { %1507 = vmatprep.subr.bf16.mxu0 %v1506_v50  ;;  %v643_v27 = vld [vmem:[%s1926_s24 + $0x108] sm:$0xff]  ;;  %v645_v28 = vld [vmem:[%s1926_s24 + $0x118] sm:$0xff]  ;;  %v1522_v30 = vpack.c.bf16 %v697_v23, %v695_v22  ;;  %v694_v31 = vld [vmem:[%s1926_s24 + $0x2a0] sm:$0xff]  ;;  %v1468_v33 = vpack.c.bf16 %v640_v26, %v638_v25 }
  0x5b   : > { %1457 = vmatpush1.bf16.msra.mxu1 %v1456_v56  ;;  %v696_v32 = vld [vmem:[%s1926_s24 + $0x2b0] sm:$0xff]  ;;  %v699_v34 = vld [vmem:[%s1926_s24 + $0x2c8] sm:$0xff]  ;;  %v701_v35 = vld [vmem:[%s1926_s24 + $0x2d8] sm:$0xff]  ;;  %v1470_v36 = vpack.c.bf16 %v645_v28, %v643_v27 }
  0x5c   : > { %1459 = vmatprep.subr.bf16.mxu1 %v1458_v60  ;;  %v642_v37 = vld [vmem:[%s1926_s24 + $0x100] sm:$0xff]  ;;  %v644_v38 = vld [vmem:[%s1926_s24 + $0x110] sm:$0xff]  ;;  %v647_v39 = vld [vmem:[%s1926_s24 + $0x128] sm:$0xff]  ;;  %v1524_v41 = vpack.c.bf16 %v696_v32, %v694_v31  ;;  %v1526_v43 = vpack.c.bf16 %v701_v35, %v699_v34 }
  0x5d   : > { %1509 = vmatpush1.bf16.msra.mxu0 %v1508_v53  ;;  %v649_v40 = vld [vmem:[%s1926_s24 + $0x138] sm:$0xff]  ;;  %v698_v44 = vld [vmem:[%s1926_s24 + $0x2c0] sm:$0xff]  ;;  %v700_v45 = vld [vmem:[%s1926_s24 + $0x2d0] sm:$0xff]  ;;  %v1472_v46 = vpack.c.bf16 %v644_v38, %v642_v37 }
  0x5e   : > { %1511 = vmatprep.subr.bf16.mxu0 %v1510_v58  ;;  %v1079_v42 = vld [vmem:[%s2213_s13 + $0x8] sm:$0xff]  ;;  %v1081_v49 = vld [vmem:[%s2213_s13 + $0x18] sm:$0xff]  ;;  %v1474_v50 = vpack.c.bf16 %v649_v40, %v647_v39  ;;  %v646_v51 = vld [vmem:[%s1926_s24 + $0x120] sm:$0xff]  ;;  %v1528_v55 = vpack.c.bf16 %v700_v45, %v698_v44 }
  0x5f   : > { %1461 = vmatpush1.bf16.msra.mxu1 %v1460_v9  ;;  %1155 = vmatprep.mubr.f32.mxu1 %v1079_v42  ;;  %v703_v47 = vld [vmem:[%s1926_s24 + $0x2e8] sm:$0xff]  ;;  %v705_v48 = vld [vmem:[%s1926_s24 + $0x2f8] sm:$0xff]  ;;  %v648_v52 = vld [vmem:[%s1926_s24 + $0x130] sm:$0xff] }
  0x60   : > { %1463 = vmatprep.subr.bf16.mxu1 %v1462_v11  ;;  %1429 = vmatprep.mubr.msk.f32.mxu0 %vm804_vm2, %v1081_v49  ;;  %v651_v53 = vld [vmem:[%s1926_s24 + $0x148] sm:$0xff]  ;;  %v653_v54 = vld [vmem:[%s1926_s24 + $0x158] sm:$0xff]  ;;  %v1530_v56 = vpack.c.bf16 %v705_v48, %v703_v47  ;;  %v702_v57 = vld [vmem:[%s1926_s24 + $0x2e0] sm:$0xff]  ;;  %v1476_v59 = vpack.c.bf16 %v648_v52, %v646_v51 }
  0x61   : > { %1513 = vmatpush1.bf16.msra.mxu0 %v1512_v1  ;;  %v704_v58 = vld [vmem:[%s1926_s24 + $0x2f0] sm:$0xff]  ;;  %v1478_v60 = vpack.c.bf16 %v653_v54, %v651_v53  ;;  %v650_v61 = vld [vmem:[%s1926_s24 + $0x140] sm:$0xff]  ;;  %v655_v63 = vld [vmem:[%s1926_s24 + $0x168] sm:$0xff] }
  0x62   : > { %1515 = vmatprep.subr.bf16.mxu0 %v1514_v4  ;;  %v652_v62 = vld [vmem:[%s1926_s24 + $0x150] sm:$0xff]  ;;  %v657_v0 = vld [vmem:[%s1926_s24 + $0x178] sm:$0xff]  ;;  %v1532_v1 = vpack.c.bf16 %v704_v58, %v702_v57  ;;  %v707_v3 = vld [vmem:[%s1926_s24 + $0x308] sm:$0xff] }
  0x63   : > { %1465 = vmatpush1.bf16.msra.mxu1 %v1464_v21  ;;  %v1480_v2 = vpack.c.bf16 %v652_v62, %v650_v61  ;;  %v1482_v4 = vpack.c.bf16 %v657_v0, %v655_v63  ;;  %v654_v7 = vld [vmem:[%s1926_s24 + $0x160] sm:$0xff]  ;;  %v656_v8 = vld [vmem:[%s1926_s24 + $0x170] sm:$0xff]  ;;  %v659_v9 = vld [vmem:[%s1926_s24 + $0x188] sm:$0xff] }
  0x64   : > { %1467 = vmatprep.subr.bf16.mxu1 %v1466_v24  ;;  %v661_v10 = vld [vmem:[%s1926_s24 + $0x198] sm:$0xff]  ;;  %v706_v11 = vld [vmem:[%s1926_s24 + $0x300] sm:$0xff]  ;;  %v1484_v12 = vpack.c.bf16 %v656_v8, %v654_v7  ;;  %v660_v16 = vld [vmem:[%s1926_s24 + $0x190] sm:$0xff] }
  0x65   : > { %1517 = vmatpush1.bf16.msra.mxu0 %v1516_v17  ;;  %v1080_v13 = vld [vmem:[%s2213_s13 + $0x10] sm:$0xff]  ;;  %v1486_v14 = vpack.c.bf16 %v661_v10, %v659_v9  ;;  %v663_v17 = vld [vmem:[%s1926_s24 + $0x1a8] sm:$0xff]  ;;  %v669_v24 = vld [vmem:[%s1926_s24 + $0x1d8] sm:$0xff] }
  0x66   : > { %1519 = vmatprep.subr.bf16.mxu0 %v1518_v18  ;;  %v658_v15 = vld [vmem:[%s1926_s24 + $0x180] sm:$0xff]  ;;  %v665_v18 = vld [vmem:[%s1926_s24 + $0x1b8] sm:$0xff]  ;;  %v664_v22 = vld [vmem:[%s1926_s24 + $0x1b0] sm:$0xff] }
  0x67   : > { %1469 = vmatpush1.bf16.msra.mxu1 %v1468_v33  ;;  %v1488_v19 = vpack.c.bf16 %v660_v16, %v658_v15  ;;  %v1490_v20 = vpack.c.bf16 %v665_v18, %v663_v17  ;;  %v662_v21 = vld [vmem:[%s1926_s24 + $0x1a0] sm:$0xff]  ;;  %v667_v23 = vld [vmem:[%s1926_s24 + $0x1c8] sm:$0xff]  ;;  %v668_v28 = vld [vmem:[%s1926_s24 + $0x1d0] sm:$0xff] }
  0x68   : > { %1471 = vmatprep.subr.bf16.mxu1 %v1470_v36  ;;  %v1492_v25 = vpack.c.bf16 %v664_v22, %v662_v21  ;;  %v1494_v26 = vpack.c.bf16 %v669_v24, %v667_v23  ;;  %v666_v27 = vld [vmem:[%s1926_s24 + $0x1c0] sm:$0xff]  ;;  %v672_v34 = vld [vmem:[%s1926_s24 + $0x1f0] sm:$0xff] }
  0x69   : > { %1521 = vmatpush1.bf16.msra.mxu0 %v1520_v29  ;;  %v671_v29 = vld [vmem:[%s1926_s24 + $0x1e8] sm:$0xff]  ;;  %v1496_v31 = vpack.c.bf16 %v668_v28, %v666_v27  ;;  %v670_v33 = vld [vmem:[%s1926_s24 + $0x1e0] sm:$0xff] }
  0x6a   : > { %1523 = vmatprep.subr.bf16.mxu0 %v1522_v30  ;;  %v673_v30 = vld [vmem:[%s1926_s24 + $0x1f8] sm:$0xff]  ;;  %v1500_v35 = vpack.c.bf16 %v672_v34, %v670_v33  ;;  %v1078_v36 = vld [vmem:[%s2213_s13] sm:$0xff] }
  0x6b   : > { %1473 = vmatpush1.bf16.msra.mxu1 %v1472_v46  ;;  %v1498_v32 = vpack.c.bf16 %v673_v30, %v671_v29  ;;  %v932_v57 = vld [vmem:[%s2210_s10] sm:$0xff] }
  0x6c   : > { %1475 = vmatprep.subr.bf16.mxu1 %v1474_v50  ;;  %v931_v58 = vld [vmem:[%s2209_s9] sm:$0xff] }
  0x6d   : > { %1525 = vmatpush1.bf16.msra.mxu0 %v1524_v41 }
  0x6e   : > { %1527 = vmatprep.subr.bf16.mxu0 %v1526_v43 }
  0x6f   : > { %1477 = vmatpush1.bf16.msra.mxu1 %v1476_v59  ;;  %v1082_v59 = vld [vmem:[%s2214_s14] sm:$0xff] }
  0x70   : > { %1479 = vmatprep.subr.bf16.mxu1 %v1478_v60  ;;  %v998_v60 = vld [vmem:[%s2212_s12] sm:$0xff] }
  0x71   : > { %1529 = vmatpush1.bf16.msra.mxu0 %v1528_v55  ;;  %v879_v55 = vld [vmem:[%s2205_s5] sm:$0xff] }
  0x72   : > { %1531 = vmatprep.subr.bf16.mxu0 %v1530_v56  ;;  %v880_v56 = vld [vmem:[%s2206_s6] sm:$0xff] }
  0x73   : > { %1481 = vmatpush1.bf16.msra.mxu1 %v1480_v2 }
  0x74   : > { %1483 = vmatprep.subr.bf16.mxu1 %v1482_v4 }
  0x75   : > { %1533 = vmatpush1.bf16.msra.mxu0 %v1532_v1 }
  0x76   : > { %1194 = vmatprep.subr.mxu0 %v707_v3 }
  0x77   : > { %1485 = vmatpush1.bf16.msra.mxu1 %v1484_v12 }
  0x78   : > { %1487 = vmatprep.subr.bf16.mxu1 %v1486_v14 }
  0x79   : > { %1195 = vmatpush1.msra.mxu0 %v706_v11 }
  0x7a   : > { %1227 = vmatmul.mubr.f32.vlgmr.msra.gmra.mrb[6].mxu0 %v1080_v13 }
  0x7b   : > { %1489 = vmatpush1.bf16.msra.mxu1 %v1488_v19 }
  0x7c   : > { %1491 = vmatprep.subr.bf16.mxu1 %v1490_v20 }
  0x7f   : > { %1493 = vmatpush1.bf16.msra.mxu1 %v1492_v25 }
  0x80   : > { %1495 = vmatprep.subr.bf16.mxu1 %v1494_v26 }
  0x83   : > { %1497 = vmatpush1.bf16.msra.mxu1 %v1496_v31 }
  0x84   : > { %1499 = vmatprep.subr.bf16.mxu1 %v1498_v32 }
  0x87   : > { %1501 = vmatpush1.bf16.msra.mxu1 %v1500_v35 }
  0x8a   : > { %1156 = vmatmul.mubr.f32.vlgmr.msra.gmra.mrb[0].mxu1 %v1078_v36 }
  0xc6   : > { %v713_v37 = vpop.permute.xlu0 %712 }
  0xc7   : > { %v802_v42 = vpop.permute.xlu1 %801 }
 0x123   : > { %v792_v38 = vpop.f32.mrb[0].mxu0 }
 0x124   : > { %v2079_v39 = vadd.f32 %v792_v38, %v713_v37  ;;  %v794_v40 = vpop.f32.mrb[1].mxu0 }
 0x125   : > { %v2081_v41 = vadd.f32 %v794_v40, %v713_v37 }
 0x126   : > { %v891_v43 = vmul.f32 %v2079_v39, %v2079_v39 }
 0x127   : > { %v874_v44 = vpop.f32.mrb[2].mxu0  ;;  %v881_v45 = vadd.f32 %v2081_v41, %v2079_v39  ;;  %v892_v46 = vmul.f32 %v2081_v41, %v2081_v41 }
 0x128   : > { %v2089_v47 = vadd.f32 %v874_v44, %v802_v42  ;;  %v876_v48 = vpop.f32.mrb[3].mxu0 }
 0x129   : > { %v2091_v49 = vadd.f32 %v876_v48, %v802_v42  ;;  %882 = vadd.xlane.f32.xlu0 %v881_v45  ;;  %v893_v50 = vadd.f32 %v892_v46, %v891_v43 }
 0x12a   : > { %v943_v51 = vmul.f32 %v2089_v47, %v2089_v47 }
 0x12b   : > { %894 = vadd.xlane.f32.xlu1 %v893_v50  ;;  %v933_v52 = vadd.f32 %v2091_v49, %v2089_v47  ;;  %v944_v53 = vmul.f32 %v2091_v49, %v2091_v49  ;;  %v1073_v61 = vpop.f32.mrb[4].mxu0 }
 0x12c   : > { %v1075_v62 = vpop.f32.mrb[5].mxu0 }
 0x12d   : > { %934 = vadd.xlane.f32.xlu0 %v933_v52  ;;  %v945_v54 = vadd.f32 %v944_v53, %v943_v51 }
 0x131   : > { %946 = vadd.xlane.f32.xlu0 %v945_v54 }
 0x13c   : > { %919 = vperm.xlu1 %1614, %v879_v55  }
 0x140   : > { %926 = vperm.xlu1 %1614, %v880_v56  }
 0x144   : > { %978 = vperm.xlu1 %1614, %v932_v57  }
 0x147   : > { %971 = vperm.xlu0 %1613, %v931_v58  }
 0x148   : > { %1085 = vperm.xlu1 %1614, %v1082_v59  }
 0x14b   : > { %1001 = vperm.xlu0 %1613, %v998_v60  }
 0x14d   : > { %v1228_v63 = vpop.f32.mrb[6].mxu0 }
 0x14e   : > { %v1230_v0 = vpop.f32.mrb[7].mxu0 }
 0x15d   : > { %v1157_v1 = vpop.f32.mrb[0].mxu1 }
 0x15e   : > { %v1159_v2 = vpop.f32.mrb[1].mxu1 }
 0x1b6   : > { %v883_v3 = vpop.xlane.xlu0 %882 }
 0x1b7   : > { %v884_v4 = vrot.slane %v883_v3, 4 }
 0x1b8   : > { %v895_v7 = vpop.xlane.xlu1 %894 }
 0x1b9   : > { %v885_v8 = vadd.f32 %v884_v4, %v883_v3  ;;  %v896_v9 = vrot.slane %v895_v7, 4 }
 0x1ba   : > { %v935_v10 = vpop.xlane.xlu0 %934 }
 0x1bb   : > { %v886_v11 = vrot.slane %v885_v8, 2  ;;  %v897_v12 = vadd.f32 %v896_v9, %v895_v7  ;;  %v936_v35 = vrot.slane %v935_v10, 4 }
 0x1bc   : > { %v2117_v13 = vpop.permute.xlu1 %919 }
 0x1bd   : > { %v898_v14 = vrot.slane %v897_v12, 2  ;;  %v887_v15 = vadd.f32 %v886_v11, %v885_v8  ;;  %v937_v37 = vadd.f32 %v936_v35, %v935_v10 }
 0x1be   : > { %v947_v19 = vpop.xlane.xlu0 %946 }
 0x1bf   : > { %v888_v16 = vrot.slane %v887_v15, 1  ;;  %v899_v17 = vadd.f32 %v898_v14, %v897_v12  ;;  %v948_v36 = vrot.slane %v947_v19, 4  ;;  %v938_v40 = vrot.slane %v937_v37, 2 }
 0x1c0   : > { %v2119_v18 = vpop.permute.xlu1 %926 }
 0x1c1   : > { %v889_v20 = vadd.f32 %v888_v16, %v887_v15  ;;  %v900_v21 = vrot.slane %v899_v17, 1  ;;  %v949_v38 = vadd.f32 %v948_v36, %v947_v19  ;;  %v939_v44 = vadd.f32 %v938_v40, %v937_v37 }
 0x1c3   : > { %1545 = vpush %v889_v20  ;;  %v901_v22 = vadd.f32 %v900_v21, %v899_v17  ;;  %v950_v42 = vrot.slane %v949_v38, 2  ;;  %v940_v46 = vrot.slane %v939_v44, 1 }
 0x1c4   : > { %v2121_v23 = vpop.permute.xlu1 %978 }
 0x1c5   : > { %1547 = vpush %v901_v22  ;;  %v951_v45 = vadd.f32 %v950_v42, %v949_v38  ;;  %v941_v51 = vadd.f32 %v940_v46, %v939_v44 }
 0x1c6   : > { %v2123_v24 = vpop.permute.xlu0 %971 }
 0x1c7   : > { %v952_v48 = vrot.slane %v951_v45, 1 }
 0x1c8   : > { %v1086_v28 = vpop.permute.xlu1 %1085 }
 0x1c9   : > { %v953_v52 = vadd.f32 %v952_v48, %v951_v45 }
 0x1ca   : > { %v1002_v25 = vpop.permute.xlu0 %1001 }
 0x1cb   : > { %v1074_v26 = vadd.f32 %v1073_v61, %v1002_v25  ;;  %v1076_v27 = vadd.f32 %v1075_v62, %v1002_v25 }
 0x1cd   : > { %v1535_v29 = vadd.f32 %v1086_v28, %v1074_v26  ;;  %v1539_v30 = vadd.f32 %v1086_v28, %v1076_v27 }
 0x1cf   : > { %v1536_v31 = vadd.f32 %v1535_v29, %v1157_v1  ;;  %v1540_v32 = vadd.f32 %v1539_v30, %v1159_v2 }
 0x1d1   : > { %v2125_v33 = vadd.f32 %v1536_v31, %v1228_v63  ;;  %v2127_v34 = vadd.f32 %v1540_v32, %v1230_v0 }
 0x1d3   : > { %v1235_v17 = vmax.f32 %v2125_v33, 0.0  ;;  %v1246_v33 = vld [vmem:[%s2216_s16] sm:$0xff] }
 0x1f4   : > { %s1546_s0 = spop %1545 }
 0x1f5   : > { %s903_s21 = smul.f32 0.00048828125, %s1546_s0 }
 0x1f6   : > { %s1548_s24 = spop %1547 }
 0x1f7   : > { %s905_s29 = smul.f32 %s903_s21, %s903_s21  ;;  %v907_v53 = vstv %s903_s21 }
 0x1f8   : > { %s904_s2 = smul.f32 0.00048828125, %s1548_s24  ;;  %v908_v54 = vsub.f32 %v2079_v39, %v907_v53  ;;  %v909_v55 = vsub.f32 %v2081_v41, %v907_v53  ;;  %s2246_s24 = sld [smem:[#allocation12_spill]] }
 0x1fa   : > { %s906_s22 = ssub.f32 %s904_s2, %s905_s29  ;;  %s1437_s29 = sshll.u32 %s1845_s28, 8 }
 0x1fc   : > { %s910_s30 = sadd.f32 1e-05, %s906_s22 }
 0x1fe   : > { %v911_v43 = vstv %s910_s30  ;;  %s2245_s30 = sld [smem:[#allocation17_spill]]  ;;  %p2248_p12 = scmp.ne.s32.totalorder %s2246_s24, 0 }
 0x1ff   : > { %1616 = vrsqrt.f32 %v911_v43 }
 0x209   : > { %v1617_v50 = vpop.eup %1616 }
 0x20a   : > { %1549 = vpush %v1617_v50 }
 0x20b   : > { %1551 = vpush %v941_v51 }
 0x20c   : > { %1553 = vpush %v953_v52 }
 0x23b   : > { %s1550_s15 = spop %1549 }
 0x23c   : > { %v914_v56 = vstv %s1550_s15  ;;  %s1552_s17 = spop %1551 }
 0x23d   : > { %v915_v57 = vmul.f32 %v914_v56, %v908_v54  ;;  %v916_v58 = vmul.f32 %v914_v56, %v909_v55  ;;  %s955_s1 = smul.f32 0.00048828125, %s1552_s17  ;;  %s1554_s20 = spop %1553 }
 0x23e   : > { %s956_s23 = smul.f32 0.00048828125, %s1554_s20 }
 0x23f   : > { %s957_s18 = smul.f32 %s955_s1, %s955_s1  ;;  %v959_v61 = vstv %s955_s1  ;;  %v922_v63 = vmul.f32 %v2117_v13, %v915_v57  ;;  %v923_v0 = vmul.f32 %v2117_v13, %v916_v58 }
 0x240   : > { %v960_v39 = vsub.f32 %v2089_v47, %v959_v61  ;;  %v961_v41 = vsub.f32 %v2091_v49, %v959_v61 }
 0x241   : > { %s958_s26 = ssub.f32 %s956_s23, %s957_s18  ;;  %v929_v7 = vadd.f32 %v2119_v18, %v922_v63  ;;  %v930_v8 = vadd.f32 %v2119_v18, %v923_v0  ;;  %v1236_v18 = vmax.f32 %v2127_v34, 0.0  ;;  %v1245_v34 = vld [vmem:[%s2245_s30] sm:$0xff] }
 0x243   : > { %s962_s0 = sadd.f32 1e-05, %s958_s26 }
 0x245   : > { %v963_v59 = vstv %s962_s0  ;;  %s1415_s0 = sshll.u32 %s1922_s19, 4 }
 0x246   : > { %1618 = vrsqrt.f32 %v963_v59  ;;  %s596_s2 = scalar_lea.vmem [#allocation5], %s1415_s0 }
 0x247   : > { %s1316_s22 = sshll.u32 %s596_s2, 4  ;;  %s2158_s22 = int_to_ptr.vmem [resolvable:$true] %s1316_s22 }
 0x248   : > { %s1660_s28 = scalar_lea.vmem %s2158_s22, 256 }
 0x249   : > { %p1661_p6 = scmp.ne.s32.totalorder %s2158_s22, %s1660_s28 }
 0x24b   : > { %p1662_p13 = pnand %p1661_p6, %p2248_p12 }
 0x24d   : > { %p1663_p8 = pneg %p1662_p13 }
 0x250   : > { %v1619_v60 = vpop.eup %1618 }
 0x251   : > { %1555 = vpush %v1619_v60 }
 0x282   : > { %s1556_s21 = spop %1555 }
 0x283   : > { %v966_v62 = vstv %s1556_s21 }
 0x284   : > { %v967_v1 = vmul.f32 %v966_v62, %v960_v39  ;;  %v968_v2 = vmul.f32 %v966_v62, %v961_v41 }
 0x286   : > { %v974_v3 = vmul.f32 %v2123_v24, %v967_v1  ;;  %v975_v4 = vmul.f32 %v2123_v24, %v968_v2 }
 0x288   : > { %v981_v47 = vadd.f32 %v2121_v23, %v974_v3  ;;  %v982_v49 = vadd.f32 %v2121_v23, %v975_v4 }
 0x28a   : > { %v983_v9 = vadd.f32 %v981_v47, %v929_v7  ;;  %v984_v10 = vadd.f32 %v982_v49, %v930_v8 }
 0x28c   : > { %v1424_v11 = vmul.f32 -1.442695, %v983_v9  ;;  %v1425_v12 = vmul.f32 -1.442695, %v984_v10 }
 0x28e   : > { %1620 = vpow2.f32 %v1424_v11 }
 0x28f   : > { %1622 = vpow2.f32 %v1425_v12 }
 0x298   : > { %v1621_v13 = vpop.eup %1620 }
 0x299   : > { %v1623_v14 = vpop.eup %1622  ;;  %v991_v15 = vadd.f32 1.0, %v1621_v13 }
 0x29a   : > { %v992_v16 = vadd.f32 1.0, %v1623_v14 }
 0x29b   : > { %1624 = vrcp.f32 %v991_v15 }
 0x29c   : > { %1626 = vrcp.f32 %v992_v16 }
 0x2a5   : > { %v1625_v19 = vpop.eup %1624 }
 0x2a6   : > { %v1627_v20 = vpop.eup %1626  ;;  %v1237_v21 = vmul.f32 %v1625_v19, %v1235_v17  ;;  %v1239_v22 = vsub.f32 1.0, %v1625_v19 }
 0x2a7   : > { %v1238_v23 = vmul.f32 %v1627_v20, %v1236_v18  ;;  %v1240_v24 = vsub.f32 1.0, %v1627_v20 }
 0x2a8   : > { %v1241_v25 = vmul.f32 %v1239_v22, %v1945_v6 }
 0x2a9   : > { %v1242_v26 = vmul.f32 %v1240_v24, %v1943_v5 }
 0x2aa   : > { %v1243_v27 = vadd.f32 %v1241_v25, %v1237_v21 }
 0x2ab   : > { %v1244_v28 = vadd.f32 %v1242_v26, %v1238_v23 }
 0x2ac   : > { %v1257_v29 = vmul.f32 %v1243_v27, %v1243_v27 }
 0x2ad   : > { %v1247_v30 = vadd.f32 %v1244_v28, %v1243_v27  ;;  %v1258_v31 = vmul.f32 %v1244_v28, %v1244_v28 }
 0x2af   : > { %1248 = vadd.xlane.f32.xlu0 %v1247_v30  ;;  %v1259_v32 = vadd.f32 %v1258_v31, %v1257_v29 }
 0x2b1   : > { %1260 = vadd.xlane.f32.xlu1 %v1259_v32 }
 0x2c2   : > { %1292 = vperm.xlu1 %1614, %v1246_v33  }
 0x2c5   : > { %1285 = vperm.xlu0 %1613, %v1245_v34  }
 0x33c   : > { %v1249_v6 = vpop.xlane.xlu0 %1248 }
 0x33d   : > { %v1250_v5 = vrot.slane %v1249_v6, 4 }
 0x33e   : > { %v1261_v35 = vpop.xlane.xlu1 %1260 }
 0x33f   : > { %v1251_v36 = vadd.f32 %v1250_v5, %v1249_v6  ;;  %v1262_v37 = vrot.slane %v1261_v35, 4 }
 0x341   : > { %v1252_v38 = vrot.slane %v1251_v36, 2  ;;  %v1263_v40 = vadd.f32 %v1262_v37, %v1261_v35 }
 0x342   : > { %v1293_v39 = vpop.permute.xlu1 %1292 }
 0x343   : > { %v1264_v42 = vrot.slane %v1263_v40, 2  ;;  %v1253_v43 = vadd.f32 %v1252_v38, %v1251_v36 }
 0x344   : > { %v1286_v59 = vpop.permute.xlu0 %1285 }
 0x345   : > { %v1254_v44 = vrot.slane %v1253_v43, 1  ;;  %v1265_v45 = vadd.f32 %v1264_v42, %v1263_v40 }
 0x347   : > { %v1255_v46 = vadd.f32 %v1254_v44, %v1253_v43  ;;  %v1266_v48 = vrot.slane %v1265_v45, 1 }
 0x349   : > { %1557 = vpush %v1255_v46  ;;  %v1267_v50 = vadd.f32 %v1266_v48, %v1265_v45 }
 0x34b   : > { %1559 = vpush %v1267_v50 }
 0x37a   : > { %s1558_s15 = spop %1557 }
 0x37b   : > { %s1269_s17 = smul.f32 0.00048828125, %s1558_s15 }
 0x37c   : > { %s1560_s1 = spop %1559 }
 0x37d   : > { %s1271_s20 = smul.f32 %s1269_s17, %s1269_s17  ;;  %v1273_v53 = vstv %s1269_s17  ;;  %s2247_s17 = sld [smem:[#allocation18_spill]] }
 0x37e   : > { %s1270_s23 = smul.f32 0.00048828125, %s1560_s1  ;;  %v1274_v54 = vsub.f32 %v1243_v27, %v1273_v53  ;;  %v1275_v55 = vsub.f32 %v1244_v28, %v1273_v53 }
 0x380   : > { %s1272_s18 = ssub.f32 %s1270_s23, %s1271_s20  ;;  %s1302_s20 = scalar_lea.sflag [#allocation4], %s1922_s19 }
 0x381   : > { %s1733_s23 = smov [#allocation5]  }
 0x382   : > { %s1276_s26 = sadd.f32 1e-05, %s1272_s18  ;;  %s1664_s18 = sshll.u32 %s1733_s23, 4  ;;  %s1665_s18 = int_to_ptr.vmem [resolvable:$false] %s1664_s18 }
 0x383   : > { %s2156_s1 = scalar_lea.hbm %s2247_s17, %s1437_s29  ;;  %p1667_p10 = scmp.lt.s32.totalorder %s2158_s22, %s1665_s18 }
 0x384   : > { %v1277_v51 = vstv %s1276_s26  ;;  %s1666_s26 = scalar_lea.vmem %s1665_s18, 512 }
 0x385   : > { %1628 = vrsqrt.f32 %v1277_v51  ;;  %p1668_p0 = scmp.lt.s32.totalorder %s1666_s26, %s1660_s28 }
 0x387   : > { %p1669_p2 = por %p1668_p0, %p1667_p10 }
 0x389   : > { %p1670_p4 = pnand %p1669_p2, %p1663_p8 }
 0x38f   : > { %v1629_v52 = vpop.eup %1628 }
 0x390   : > { %1561 = vpush %v1629_v52 }
 0x3c1   : > { %s1562_s21 = spop %1561 }
 0x3c2   : > { %v1280_v56 = vstv %s1562_s21 }
 0x3c3   : > { %v1281_v57 = vmul.f32 %v1280_v56, %v1274_v54  ;;  %v1282_v58 = vmul.f32 %v1280_v56, %v1275_v55 }
 0x3c5   : > { %v1288_v60 = vmul.f32 %v1286_v59, %v1281_v57  ;;  %v1289_v61 = vmul.f32 %v1286_v59, %v1282_v58 }
 0x3c7   : > { %v1295_v41 = vadd.f32 %v1293_v39, %v1288_v60  ;;  %v1296_v62 = vadd.f32 %v1293_v39, %v1289_v61 }
 0x3c9   : > { %v1297_v63 = vmax.f32 %v1295_v41, 0.0  ;;  %v1298_v0 = vmax.f32 %v1296_v62, 0.0 }
 0x3cb   : > { %1299 = vst [vmem:[%s596_s2] sm:$0xff] %v1297_v63  ;;  %1300 = vst [vmem:[%s596_s2 + $0x8] sm:$0xff] %v1298_v0 }
 0x3cc   : > { %1673 = shalt.err (!%p1670_p4)
}
 0x3cd   : > { %s1674_s19 = scalar_lea.hbm %s2156_s1, 256  ;;  %s1678_s29 = scalar_lea.hbm %s2247_s17, 512 }
 0x3ce   : > { %p1675_p5 = scmp.ne.s32.totalorder %s2156_s1, %s1674_s19  ;;  %p1679_p1 = scmp.lt.u32.totalorder %s2156_s1, %s2247_s17 }
 0x3cf   : > { %p1680_p3 = scmp.lt.u32.totalorder %s1678_s29, %s1674_s19  ;;  %p1682_p6 = scmp.lt.u32.totalorder %s1674_s19, %s2156_s1 }
 0x3d0   : > { %p1676_p7 = pnand %p1675_p5, %p2248_p12 }
 0x3d1   : > { %p1681_p11 = por %p1680_p3, %p1679_p1 }
 0x3d2   : > { %p1677_p9 = pneg %p1676_p7 }
 0x3d3   : > { %p1683_p13 = por %p1682_p6, %p1681_p11 }
 0x3d5   : > { %p1684_p8 = pnand %p1683_p13, %p1677_p9 }
 0x3d7   : > { %1687 = shalt.err (!%p1684_p8)
}
 0x3d8   : > { %1565 = dma.vmem_to_hbm [thread:$0]  (%p2248_p12), %s2158_s22, 256, %s2156_s1, %s1302_s20  }
 0x3d9 PF: > { %s2249_s15 = sld [smem:[#allocation8_spill]]  ;;  %s2250_s28 = sld [smem:[#allocation13_spill]] }
 0x3da   : > { %p2252_p0 = scmp.ge.s32.totalorder %s1726_s27, 2 }
 0x3df   : > { %s1328_s23 = sand.u32 1, %s2249_s15   ;;  %p2251_p10 = scmp.ne.s32.totalorder %s2250_s28, 0 }
 0x3e0   : > { %s1329_s18 = scalar_lea.sflag [#allocation4], %s1328_s23 }
 0x3e1   : > { %p1572_p2 = pnand %p2252_p0, %p2251_p10 }
 0x3e3   : > { %1709 = dma.done.wait (!%p1572_p2), %s1329_s18, 256  }
 0x3e4   : > { %1711 = vsyncadd (!%p1572_p2), %s1329_s18, 4294967040  ;;  %s2253_s27 = sld [smem:[#allocation10_spill]]  ;;  %s2254_s26 = sld [smem:[#allocation9_spill]] }
 0x3e5   : > { %s2255_s19 = sld [smem:[#allocation11_spill]]  ;;  %s2256_s24 = smov %s1718_s25 }
 0x3ea   : > { %p30_p4 = scmp.ge.s32.totalorder %s2253_s27, 4   ;;  %s2257_s25 = smov %s2254_s26 }
 0x3eb   : > { %s2258_s26 = smov %s2255_s19 }
 0x3ec   :  { %32 = sbr.rel (!%p30_p4) target bundleno = 11 (0xb), region = 139 }
 0x3f3   :  { %1334 = vsyncpa [#allocation3], 1 }
 0x3f4   :  { %1336 = vsyncpa [#allocation3 + $0x1], 1 }
 0x3f5   :  { %1337 = vsyncpa [#allocation4], 1 }
 0x3f6   :  { %1339 = vsyncpa [#allocation4 + $0x1], 1 }

</bundles_post_ra>
